<compile_context>
chip_gen: v5e
topology: v5e:2x2
jax: 0.10.0
libtpu: 0.0.40
codegen_flags: <defaults>
</compile_context>

<pallas_src>
import functools

import jax
import jax.numpy as jnp
from jax.experimental import pallas as pl
from jax.experimental.pallas import tpu as pltpu


def _feature_projection_kernel(x_ref, g_ref, b_ref, w_ref, pb_ref,
                               proj_ref, norm_ref, *, eps):
    # x_ref:   (TM, C)   input rows
    # g_ref:   (1, C)    layer-norm weight (gamma)
    # b_ref:   (1, C)    layer-norm bias (beta)
    # w_ref:   (C, H)    projection weight, already transposed to [in, out]
    # pb_ref:  (1, H)    projection bias
    # proj_ref:(TM, H)   projected output
    # norm_ref:(TM, C)   layer-normed output

    # --- LayerNorm over last dim (f32 math for stability) ---
    x = x_ref[...].astype(jnp.float32)
    mean = jnp.mean(x, axis=-1, keepdims=True)
    centered = x - mean
    var = jnp.mean(centered * centered, axis=-1, keepdims=True)
    inv = jax.lax.rsqrt(var + eps)
    norm = centered * inv
    norm = norm * g_ref[...].astype(jnp.float32) + b_ref[...].astype(jnp.float32)
    norm_ref[...] = norm.astype(norm_ref.dtype)

    # --- Linear projection on the MXU: canonical (TM, C) x (C, H) ---
    w = w_ref[...]
    proj = jnp.dot(norm.astype(w.dtype), w,
                   preferred_element_type=jnp.float32)
    proj = proj + pb_ref[...].astype(jnp.float32)
    # Dropout is identity in eval/inference mode.
    proj_ref[...] = proj.astype(proj_ref.dtype)


def _round_up(v, m):
    return (v + m - 1) // m * m


def wav2vec2_feature_projection(hidden_states, ln_weight, ln_bias,
                                proj_weight, proj_bias, *, eps=1e-5,
                                row_tile=512, matmul_dtype=None):
    """hidden_states: [B, T, C]; proj_weight: [H, C] (PyTorch [out, in] layout).

    Returns (projected [B, T, H], norm_hidden_states [B, T, C]).
    matmul_dtype: optional dtype (e.g. jnp.bfloat16) for the MXU operands;
    accumulation stays in f32."""
    B, T, C = hidden_states.shape
    H = proj_weight.shape[0]
    rows = B * T

    # ---- Row tile selection ----
    # Big tile (default 512) for MXU/DMA efficiency, multiple of 8 sublanes,
    # never bigger than the (8-rounded) row count. Guarantee >= 2 grid steps
    # (when possible) so both v7x TensorCores get work on the parallel axis.
    tile = min(row_tile, _round_up(rows, 8))
    tile = max(8, _round_up(tile, 8))
    if rows > 8 and pl.cdiv(rows, tile) < 2:
        tile = max(8, _round_up(pl.cdiv(rows, 2), 8))
    grid_steps = pl.cdiv(rows, tile)

    x2d = hidden_states.reshape(rows, C)
    g = ln_weight.reshape(1, C)
    b = ln_bias.reshape(1, C)
    pb = proj_bias.reshape(1, H)

    # One-time host-side transpose to (C, H); amortized across all grid steps
    # (and folded by XLA when this wrapper is jitted with the weights).
    w_t = jnp.transpose(proj_weight)
    if matmul_dtype is not None:
        w_t = w_t.astype(matmul_dtype)

    xb = jnp.dtype(hidden_states.dtype).itemsize
    wb = jnp.dtype(w_t.dtype).itemsize
    ob = xb

    # ---- VMEM budget (generation-aware cap) ----
    vmem_bytes = (
        2 * tile * C * xb          # double-buffered input tile
        + 2 * tile * H * ob        # double-buffered proj output tile
        + 2 * tile * C * ob        # double-buffered norm output tile
        + 2 * C * H * wb           # projection weight
        + 2 * 2 * C * jnp.dtype(ln_weight.dtype).itemsize   # ln gamma/beta
        + 2 * H * jnp.dtype(proj_bias.dtype).itemsize       # proj bias
    )
    try:
        vmem_cap = int(pltpu.get_tpu_info().vmem_capacity_bytes)
    except Exception:
        vmem_cap = 64 << 20  # conservative (v7x per-TC VMEM)
    vmem_limit = int(vmem_bytes * 1.5) + (2 << 20)
    vmem_limit = max(vmem_limit, 32 << 20)
    vmem_limit = min(vmem_limit, (vmem_cap * 3) // 4)

    cost = pl.CostEstimate(
        flops=2 * rows * C * H + 8 * rows * C,
        transcendentals=rows,  # one rsqrt per row
        bytes_accessed=(rows * C * xb + C * H * wb
                        + rows * H * ob + rows * C * ob),
    )

    kernel = functools.partial(_feature_projection_kernel, eps=eps)

    proj_out, norm_out = pl.pallas_call(
        kernel,
        out_shape=(
            jax.ShapeDtypeStruct((rows, H), hidden_states.dtype),
            jax.ShapeDtypeStruct((rows, C), hidden_states.dtype),
        ),
        grid_spec=pltpu.PrefetchScalarGridSpec(
            num_scalar_prefetch=0,
            grid=(grid_steps,),
            in_specs=[
                pl.BlockSpec((tile, C), lambda i: (i, 0)),   # x rows
                pl.BlockSpec((1, C), lambda i: (0, 0)),      # ln weight
                pl.BlockSpec((1, C), lambda i: (0, 0)),      # ln bias
                pl.BlockSpec((C, H), lambda i: (0, 0)),      # proj weight (C, H)
                pl.BlockSpec((1, H), lambda i: (0, 0)),      # proj bias
            ],
            out_specs=[
                pl.BlockSpec((tile, H), lambda i: (i, 0)),
                pl.BlockSpec((tile, C), lambda i: (i, 0)),
            ],
        ),
        compiler_params=pltpu.CompilerParams(
            dimension_semantics=("parallel",),
            vmem_limit_bytes=vmem_limit),
        cost_estimate=cost,
    )(x2d, g, b, w_t, pb)

    return proj_out.reshape(B, T, H), norm_out.reshape(B, T, C)


def _reference(hidden_states, ln_weight, ln_bias, proj_weight, proj_bias, eps=1e-5):
    x = hidden_states.astype(jnp.float32)
    mean = jnp.mean(x, axis=-1, keepdims=True)
    var = jnp.var(x, axis=-1, keepdims=True)
    norm = (x - mean) * jax.lax.rsqrt(var + eps)
    norm = norm * ln_weight + ln_bias
    proj = norm @ proj_weight.T.astype(jnp.float32) + proj_bias
    return proj, norm


if __name__ == "__main__":
    # Synthetic config: conv_dim[-1] = 128, hidden_size = 256
    C, Hs = 128, 256
    eps = 1e-5

    key = jax.random.PRNGKey(0)
    k1, k2, k3, k4, k5 = jax.random.split(key, 5)
    ln_weight = 1.0 + 0.1 * jax.random.normal(k2, (C,), dtype=jnp.float32)
    ln_bias = 0.1 * jax.random.normal(k3, (C,), dtype=jnp.float32)
    proj_weight = 0.02 * jax.random.normal(k4, (Hs, C), dtype=jnp.float32)  # PyTorch [out, in]
    proj_bias = 0.01 * jax.random.normal(k5, (Hs,), dtype=jnp.float32)

    # Case 1: small, tile-aligned shape.
    B, T = 2, 8
    hidden_states = jax.random.normal(k1, (B, T, C), dtype=jnp.float32)
    proj, norm = wav2vec2_feature_projection(
        hidden_states, ln_weight, ln_bias, proj_weight, proj_bias, eps=eps)
    jax.block_until_ready((proj, norm))
    ref_proj, ref_norm = _reference(hidden_states, ln_weight, ln_bias,
                                    proj_weight, proj_bias, eps=eps)
    assert proj.shape == (B, T, Hs) and norm.shape == (B, T, C)
    assert jnp.allclose(proj, ref_proj, atol=1e-4, rtol=1e-4)
    assert jnp.allclose(norm, ref_norm, atol=1e-4, rtol=1e-4)

    # Case 2: row count not a multiple of the tile (exercises the masked
    # ragged tail block — no host pad / output slice anymore).
    B2, T2 = 3, 50
    hidden_states2 = jax.random.normal(jax.random.PRNGKey(7), (B2, T2, C),
                                       dtype=jnp.float32)
    proj2, norm2 = wav2vec2_feature_projection(
        hidden_states2, ln_weight, ln_bias, proj_weight, proj_bias, eps=eps)
    jax.block_until_ready((proj2, norm2))
    ref_proj2, ref_norm2 = _reference(hidden_states2, ln_weight, ln_bias,
                                      proj_weight, proj_bias, eps=eps)
    assert proj2.shape == (B2, T2, Hs) and norm2.shape == (B2, T2, C)
    assert jnp.allclose(proj2, ref_proj2, atol=1e-4, rtol=1e-4)
    assert jnp.allclose(norm2, ref_norm2, atol=1e-4, rtol=1e-4)

    # Case 3: bf16 MXU operands with f32 accumulation (looser tolerance).
    proj3, norm3 = wav2vec2_feature_projection(
        hidden_states2, ln_weight, ln_bias, proj_weight, proj_bias, eps=eps,
        matmul_dtype=jnp.bfloat16)
    jax.block_until_ready((proj3, norm3))
    assert jnp.allclose(proj3, ref_proj2, atol=2e-2, rtol=2e-2)
    assert jnp.allclose(norm3, ref_norm2, atol=1e-4, rtol=1e-4)

    print("KERNEL_OK")
</pallas_src>

<mosaic_0001>
module attributes {stable_mosaic.version = 11 : i64} {
  func.func @_feature_projection_kernel(%arg0: i32, %arg1: memref<8x128xf32, #tpu.memory_space<vmem>>, %arg2: memref<1x128xf32, #tpu.memory_space<vmem>>, %arg3: memref<1x128xf32, #tpu.memory_space<vmem>>, %arg4: memref<128x256xf32, #tpu.memory_space<vmem>>, %arg5: memref<1x256xf32, #tpu.memory_space<vmem>>, %arg6: memref<8x256xf32, #tpu.memory_space<vmem>>, %arg7: memref<8x128xf32, #tpu.memory_space<vmem>>) attributes {dimension_semantics = [#tpu.dimension_semantics<parallel>], iteration_bounds = array<i64: 2>, scalar_prefetch = 0 : i64, scratch_operands = 0 : i64, tpu.core_type = #tpu.core_type<tc>, window_params = [{transform_indices = @transform_0, window_bounds = array<i64: 8, 128>}, {pipeline_mode = #tpu.pipeline_mode<synchronous>, transform_indices = @transform_1, window_bounds = array<i64: 1, 128>}, {pipeline_mode = #tpu.pipeline_mode<synchronous>, transform_indices = @transform_2, window_bounds = array<i64: 1, 128>}, {pipeline_mode = #tpu.pipeline_mode<synchronous>, transform_indices = @transform_3, window_bounds = array<i64: 128, 256>}, {pipeline_mode = #tpu.pipeline_mode<synchronous>, transform_indices = @transform_4, window_bounds = array<i64: 1, 256>}, {transform_indices = @transform_5, window_bounds = array<i64: 8, 256>}, {transform_indices = @transform_6, window_bounds = array<i64: 8, 128>}]} {
    %c0 = arith.constant 0 : index
    %c0_0 = arith.constant 0 : index
    %0 = vector.load %arg1[%c0, %c0_0] : memref<8x128xf32, #tpu.memory_space<vmem>>, vector<8x128xf32>
    %cst = arith.constant dense<0.000000e+00> : vector<8xf32>
    %1 = vector.multi_reduction <add>, %0, %cst [1] : vector<8x128xf32> to vector<8xf32>
    %2 = vector.shape_cast %1 : vector<8xf32> to vector<8x1xf32>
    %cst_1 = arith.constant 1.280000e+02 : f32
    %3 = vector.broadcast %cst_1 : f32 to vector<8x1xf32>
    %4 = arith.divf %2, %3 : vector<8x1xf32>
    %5 = vector.broadcast %4 : vector<8x1xf32> to vector<8x128xf32>
    %6 = arith.subf %0, %5 : vector<8x128xf32>
    %7 = arith.mulf %6, %6 : vector<8x128xf32>
    %cst_2 = arith.constant dense<0.000000e+00> : vector<8xf32>
    %8 = vector.multi_reduction <add>, %7, %cst_2 [1] : vector<8x128xf32> to vector<8xf32>
    %9 = vector.shape_cast %8 : vector<8xf32> to vector<8x1xf32>
    %cst_3 = arith.constant 1.280000e+02 : f32
    %10 = vector.broadcast %cst_3 : f32 to vector<8x1xf32>
    %11 = arith.divf %9, %10 : vector<8x1xf32>
    %cst_4 = arith.constant 9.99999974E-6 : f32
    %12 = vector.broadcast %cst_4 : f32 to vector<8x1xf32>
    %13 = arith.addf %11, %12 : vector<8x1xf32>
    %14 = math.rsqrt %13 : vector<8x1xf32>
    %15 = vector.broadcast %14 : vector<8x1xf32> to vector<8x128xf32>
    %16 = arith.mulf %6, %15 : vector<8x128xf32>
    %c0_5 = arith.constant 0 : index
    %c0_6 = arith.constant 0 : index
    %17 = vector.load %arg2[%c0_5, %c0_6] : memref<1x128xf32, #tpu.memory_space<vmem>>, vector<1x128xf32>
    %18 = vector.broadcast %17 : vector<1x128xf32> to vector<8x128xf32>
    %19 = arith.mulf %16, %18 : vector<8x128xf32>
    %c0_7 = arith.constant 0 : index
    %c0_8 = arith.constant 0 : index
    %20 = vector.load %arg3[%c0_7, %c0_8] : memref<1x128xf32, #tpu.memory_space<vmem>>, vector<1x128xf32>
    %21 = vector.broadcast %20 : vector<1x128xf32> to vector<8x128xf32>
    %22 = arith.addf %19, %21 : vector<8x128xf32>
    %c0_9 = arith.constant 0 : index
    %c0_10 = arith.constant 0 : index
    %23 = vector.load %arg7[%c0_9, %c0_10] : memref<8x128xf32, #tpu.memory_space<vmem>>, vector<8x128xf32>
    tpu.vector_store %arg7[%c0_9, %c0_10], %22 {strides = array<i32>} : memref<8x128xf32, #tpu.memory_space<vmem>>, vector<8x128xf32>,
    %c0_11 = arith.constant 0 : index
    %c0_12 = arith.constant 0 : index
    %24 = vector.load %arg4[%c0_11, %c0_12] : memref<128x256xf32, #tpu.memory_space<vmem>>, vector<128x256xf32>
    %cst_13 = arith.constant dense<0.000000e+00> : vector<8x256xf32>
    %25 = tpu.matmul %22, %24, %cst_13 {dimension_numbers = #tpu.dot_dimension_numbers<[1], [0], [0], [1], [0, 0, 1, 1], [], []>} : vector<8x128xf32>, vector<128x256xf32>, vector<8x256xf32> -> vector<8x256xf32>
    %c0_14 = arith.constant 0 : index
    %c0_15 = arith.constant 0 : index
    %26 = vector.load %arg5[%c0_14, %c0_15] : memref<1x256xf32, #tpu.memory_space<vmem>>, vector<1x256xf32>
    %27 = vector.broadcast %26 : vector<1x256xf32> to vector<8x256xf32>
    %28 = arith.addf %25, %27 : vector<8x256xf32>
    %c0_16 = arith.constant 0 : index
    %c0_17 = arith.constant 0 : index
    %29 = vector.load %arg6[%c0_16, %c0_17] : memref<8x256xf32, #tpu.memory_space<vmem>>, vector<8x256xf32>
    tpu.vector_store %arg6[%c0_16, %c0_17], %28 {strides = array<i32>} : memref<8x256xf32, #tpu.memory_space<vmem>>, vector<8x256xf32>,
    return
  }
  func.func @transform_0(%arg0: i32) -> (i32, i32) {
    %c0_i32 = arith.constant 0 : i32
    %c0_i32_0 = arith.constant 0 : i32
    return %arg0, %c0_i32 : i32, i32
  }
  func.func @transform_1(%arg0: i32) -> (i32, i32) {
    %c0_i32 = arith.constant 0 : i32
    %c0_i32_0 = arith.constant 0 : i32
    %c0_i32_1 = arith.constant 0 : i32
    return %c0_i32, %c0_i32_0 : i32, i32
  }
  func.func @transform_2(%arg0: i32) -> (i32, i32) {
    %c0_i32 = arith.constant 0 : i32
    %c0_i32_0 = arith.constant 0 : i32
    %c0_i32_1 = arith.constant 0 : i32
    return %c0_i32, %c0_i32_0 : i32, i32
  }
  func.func @transform_3(%arg0: i32) -> (i32, i32) {
    %c0_i32 = arith.constant 0 : i32
    %c0_i32_0 = arith.constant 0 : i32
    %c0_i32_1 = arith.constant 0 : i32
    return %c0_i32, %c0_i32_0 : i32, i32
  }
  func.func @transform_4(%arg0: i32) -> (i32, i32) {
    %c0_i32 = arith.constant 0 : i32
    %c0_i32_0 = arith.constant 0 : i32
    %c0_i32_1 = arith.constant 0 : i32
    return %c0_i32, %c0_i32_0 : i32, i32
  }
  func.func @transform_5(%arg0: i32) -> (i32, i32) {
    %c0_i32 = arith.constant 0 : i32
    %c0_i32_0 = arith.constant 0 : i32
    return %arg0, %c0_i32 : i32, i32
  }
  func.func @transform_6(%arg0: i32) -> (i32, i32) {
    %c0_i32 = arith.constant 0 : i32
    %c0_i32_0 = arith.constant 0 : i32
    return %arg0, %c0_i32 : i32, i32
  }
}

</mosaic_0001>

<bundles_post_ra>
// kernel: tpu_custom_call.1
= control target key start
LH: loop header
LB: loop body
LE: loop exit
PB: predicated region body
PF: predicated region fallthrough
CT: control target
= control target key end

     0   :  { %s1100_s0 = inlined_call_operand.hbm [shape: f32[16,128], index: 0, kind: input, shape index: {}]   ;;  %s1101_s1 = inlined_call_operand.hbm [shape: f32[1,128], index: 1, kind: input, shape index: {}]   ;;  %s1102_s2 = inlined_call_operand.vmem [shape: f32[1,128], index: 2, kind: input, shape index: {}]   ;;  %s1103_s3 = inlined_call_operand.hbm [shape: f32[128,256], index: 3, kind: input, shape index: {}]   ;;  %s1104_s4 = inlined_call_operand.vmem [shape: f32[1,256], index: 4, kind: input, shape index: {}]   ;;  %s1105_s5 = inlined_call_operand.hbm [shape: f32[16,256], index: 5, kind: output, shape index: {0}]   ;;  %s1106_s6 = inlined_call_operand.hbm [shape: f32[16,128], index: 6, kind: output, shape index: {1}]  }
   0x1   :  { %1107 = sst [smem:[#allocation15_spill]] %s1100_s0 }
   0x2   :  { %12 = vsyncpa [#allocation3], 0 }
   0x3   :  { %14 = vsyncpa [#allocation3 + $0x1], 0 }
   0x4   :  { %15 = vsyncpa [#allocation6], 0 }
   0x5   :  { %16 = vsyncpa [#allocation4], 0 }
   0x6   :  { %18 = vsyncpa [#allocation4 + $0x1], 0 }
   0x7   :  { %19 = vsyncpa [#allocation10], 0 }
   0x8   :  { %21 = vsyncpa [#allocation10 + $0x1], 0  ;;  %s924_s21 = smov 0   ;;  %s926_s22 = smov 0  }
   0x9   :  { %s928_s23 = smov 0   ;;  %s930_s24 = smov 0  }
   0xa LB: > { %s945_s25 = sadd.s32 4294967295, %s882_s24   ;;  %s588_s26 = sadd.s32 4294967294, %s882_s24   ;;  %s882_s24 = sphi %s930_s24, %s1118_s24   ;;  %s878_s23 = sphi %s928_s23, %s1117_s23   ;;  %s874_s22 = sphi %s926_s22, %s1116_s22   ;;  %s870_s21 = sphi %s924_s21, %s1115_s21  }
   0xb   : > { %p47_p0 = scmp.ne.s32.totalorder %s874_s22, %s870_s21  ;;  %p48_p1 = scmp.eq.s32.totalorder %s945_s25, 0 }
   0xc   : > { %p155_p2 = scmp.eq.s32.totalorder %s945_s25, 1  ;;  %p161_p3 = scmp.eq.s32.totalorder %s588_s26, 1 }
   0xd   : > { %p954_p4 = por %p48_p1, %p47_p0  ;;  %p589_p5 = scmp.ge.s32.totalorder %s882_s24, 1 }
   0xe   : > { %p959_p6 = por %p161_p3, %p47_p0  ;;  %p194_p7 = scmp.lt.s32.totalorder %s882_s24, 3 }
   0xf   : > { %s206_s7 = sshll.u32 %s1101_s1, 4  ;;  %s884_s9 = smov [#allocation5]   ;;  %s207_s7 = int_to_ptr.hbm [resolvable:$true] %s206_s7 }
  0x10   : > { %p967_p8 = pnand %p589_p5, %p194_p7  ;;  %s208_s10 = sshll.u32 %s884_s9, 4  ;;  %s209_s10 = int_to_ptr.vmem [resolvable:$true] %s208_s10 }
  0x11   : > { %s220_s13 = sshll.u32 %s1103_s3, 4  ;;  %s885_s14 = smov [#allocation7]   ;;  %s221_s13 = int_to_ptr.hbm [resolvable:$true] %s220_s13 }
  0x12   : > { %p623_p10 = pneg %p967_p8  ;;  %s222_s15 = sshll.u32 %s885_s14, 4  ;;  %s223_s15 = int_to_ptr.vmem [resolvable:$true] %s222_s15 }
  0x13   : > { %s886_s16 = smov 256   ;;  %s887_s17 = smov 16  }
  0x14   : > { %p624_p11 = pnand %p623_p10, %p48_p1  ;;  %s980_s18 = sadd.s32 1, %s882_s24  }
  0x15   : > { %s31_s19 = ssub.s32 %s882_s24, %s980_s18  ;;  %s34_s20 = sadd.s32 1, %s878_s23 }
  0x16   : > { %626 = dma.hbm_to_vmem [thread:$0]  (!%p624_p11), %s207_s7, 16, %s209_s10, [#allocation6]  }
  0x17   : > { %629 = dma.hbm_to_vmem [thread:$0]  (!%p624_p11), %s221_s13, 4096, %s223_s15, [#allocation6], %s886_s16, %s886_s16, %s887_s17  }
  0x18   : > { %p32_p12 = scmp.eq.s32.totalorder %s31_s19, 0  ;;  %p41_p13 = scmp.ne.s32.totalorder %s878_s23, %s874_s22 }
  0x19   : > { %p42_p0 = scmp.eq.s32.totalorder %s882_s24, 0  ;;  %p643_p7 = scmp.lt.s32.totalorder %s882_s24, 2 }
  0x1a   : > { %s989_s26 = scalar_select %p32_p12, %s878_s23, %s34_s20  }
  0x1b   : > { %p43_p3 = por %p42_p0, %p41_p13  ;;  %p993_p5 = por %p155_p2, %p41_p13 }
  0x1c   : > { %s239_s30 = sand.u32 1, %s878_s23   ;;  %s594_s9 = sshll.u32 %s882_s24, 3 }
  0x1d   : > { %s593_s7 = sshll.u32 %s239_s30, 3  ;;  %s1112_s0 = sld [smem:[#allocation15_spill]] }
  0x1e   : > { %s243_s13 = scalar_lea.vmem [#allocation2], %s593_s7  ;;  %p1003_p10 = pnand %p643_p7, %p43_p3 }
  0x1f   : > { %s251_s14 = sshll.u32 %s243_s13, 4  ;;  %s240_s17 = scalar_lea.sflag [#allocation3], %s239_s30  ;;  %s252_s14 = int_to_ptr.vmem [resolvable:$true] %s251_s14 }
  0x20   : > { %p754_p11 = pneg %p1003_p10 }
  0x23   : > { %s247_s12 = scalar_lea.hbm %s1112_s0, %s594_s9  ;;  %s757_s10 = scalar_lea.hbm %s1112_s0, 16 }
  0x24   : > { %s249_s15 = sshll.u32 %s247_s12, 4  ;;  %s250_s15 = int_to_ptr.hbm [resolvable:$true] %s249_s15 }
  0x25   : > { %s750_s19 = sshra.s32 %s250_s15, 4  ;;  %s751_s19 = int_to_ptr.hbm [resolvable:$true] %s750_s19 }
  0x26   : > { %s752_s20 = scalar_lea.hbm %s751_s19, 8  ;;  %p758_p0 = scmp.lt.s32.totalorder %s751_s19, %s1112_s0 }
  0x27   : > { %p753_p2 = scmp.ne.s32.totalorder %s751_s19, %s752_s20  ;;  %p759_p3 = scmp.lt.s32.totalorder %s757_s10, %s752_s20 }
  0x29   : > { %p755_p12 = pnand %p754_p11, %p753_p2  ;;  %p760_p7 = por %p759_p3, %p758_p0 }
  0x2b   : > { %p756_p13 = pneg %p755_p12 }
  0x2d   : > { %p761_p9 = pnand %p760_p7, %p756_p13 }
  0x2f   : > { %764 = shalt.err (!%p761_p9)
}
  0x30   : > { %633 = dma.hbm_to_vmem [thread:$0]  (!%p1003_p10), %s250_s15, 128, %s252_s14, %s240_s17  }
  0x31   : > { %260 = sbr.rel (%p967_p8) target bundleno = 456 (0x1c8), region = 40  ;;  %s1020_s30 = sand.u32 (!%p967_p8), 1, %s874_s22  }
  0x32   : > { %s596_s13 = sshll.u32 (!%p967_p8), %s1020_s30, 3  ;;  %s263_s9 = scalar_lea.sflag (!%p967_p8), [#allocation3], %s1020_s30 }
  0x33   : > { %s266_s19 = scalar_lea.vmem (!%p967_p8), [#allocation2], %s596_s13 }
  0x36   : > { %853 = dma.done.wait (%p954_p4), %s263_s9, 128  }
  0x37   : > { %855 = vsyncadd (%p954_p4), %s263_s9, 4294967168 }
  0x38   : > { %857 = dma.done.wait (%p48_p1), [#allocation6], 4112  }
  0x39   : > { %859 = vsyncadd (%p48_p1), [#allocation6], 4294963184  ;;  %v311_v0 = vld [vmem:[%s266_s19] sm:$0xff]  ;;  %v888_v1 = vmov 128.0   ;;  %v378_v4 = vld [vmem:[#allocation7 + $0xe0] sm:$0xff]  ;;  %s605_s14 = sshll.u32 %s945_s25, 3 }
  0x3a   : > { %312 = vadd.xlane.f32.xlu0 %v311_v0  ;;  %686 = vrcp.f32 %v888_v1  ;;  %v380_v2 = vld [vmem:[#allocation7 + $0xf0] sm:$0xff]  ;;  %v381_v3 = vld [vmem:[#allocation7 + $0xf8] sm:$0xff]  ;;  %v379_v5 = vld [vmem:[#allocation7 + $0xe8] sm:$0xff]  ;;  %s310_s15 = scalar_lea.vmem [#allocation9], %s596_s13  ;;  %s461_s20 = scalar_lea.hbm %s1106_s6, %s605_s14 }
  0x3b   : > { %388 = vmatpush.msra.mxu0 %v380_v2  ;;  %408 = vmatpush.msra.mxu1 %v381_v3  ;;  %v376_v16 = vld [vmem:[#allocation7 + $0xd0] sm:$0xff]  ;;  %v377_v17 = vld [vmem:[#allocation7 + $0xd8] sm:$0xff]  ;;  %v374_v18 = vld [vmem:[#allocation7 + $0xc0] sm:$0xff]  ;;  %s463_s7 = sshll.u32 %s310_s15, 4  ;;  %s465_s10 = sshll.u32 %s461_s20, 4  ;;  %s464_s7 = int_to_ptr.vmem [resolvable:$true] %s463_s7  ;;  %s466_s10 = int_to_ptr.hbm [resolvable:$true] %s465_s10 }
  0x3c   : > { %v375_v19 = vld [vmem:[#allocation7 + $0xc8] sm:$0xff]  ;;  %v372_v20 = vld [vmem:[#allocation7 + $0xb0] sm:$0xff]  ;;  %v373_v21 = vld [vmem:[#allocation7 + $0xb8] sm:$0xff]  ;;  %s436_s11 = scalar_lea.sflag [#allocation10], %s1020_s30  ;;  %s794_s12 = sshra.s32 %s466_s10, 4  ;;  %s795_s12 = int_to_ptr.hbm [resolvable:$true] %s794_s12 }
  0x3d   : > { %389 = vmatpush.msra.mxu0 %v378_v4  ;;  %409 = vmatpush.msra.mxu1 %v379_v5  ;;  %v370_v22 = vld [vmem:[#allocation7 + $0xa0] sm:$0xff]  ;;  %v371_v23 = vld [vmem:[#allocation7 + $0xa8] sm:$0xff]  ;;  %v368_v24 = vld [vmem:[#allocation7 + $0x90] sm:$0xff]  ;;  %s796_s9 = scalar_lea.hbm %s795_s12, 8  ;;  %s800_s13 = scalar_lea.hbm %s1106_s6, 16 }
  0x3e   : > { %v369_v25 = vld [vmem:[#allocation7 + $0x98] sm:$0xff]  ;;  %v366_v26 = vld [vmem:[#allocation7 + $0x80] sm:$0xff]  ;;  %v367_v27 = vld [vmem:[#allocation7 + $0x88] sm:$0xff]  ;;  %p797_p1 = scmp.ne.s32.totalorder %s795_s12, %s796_s9  ;;  %p801_p9 = scmp.lt.s32.totalorder %s795_s12, %s1106_s6 }
  0x3f   : > { %390 = vmatpush.msra.mxu0 %v376_v16  ;;  %410 = vmatpush.msra.mxu1 %v377_v17  ;;  %v364_v28 = vld [vmem:[#allocation7 + $0x70] sm:$0xff]  ;;  %v365_v29 = vld [vmem:[#allocation7 + $0x78] sm:$0xff]  ;;  %v362_v30 = vld [vmem:[#allocation7 + $0x60] sm:$0xff]  ;;  %p802_p10 = scmp.lt.s32.totalorder %s800_s13, %s796_s9 }
  0x40   : > { %v687_v6 = vpop.eup %686  ;;  %v363_v31 = vld [vmem:[#allocation7 + $0x68] sm:$0xff]  ;;  %v360_v32 = vld [vmem:[#allocation7 + $0x50] sm:$0xff]  ;;  %v361_v33 = vld [vmem:[#allocation7 + $0x58] sm:$0xff]  ;;  %p798_p4 = pnand %p797_p1, %p993_p5 }
  0x41   : > { %v315_v7 = vmul.f32 128.0, %v687_v6  ;;  %vm319_vm0 = vweird.f32 %v687_v6  ;;  %391 = vmatpush.msra.mxu0 %v374_v18  ;;  %411 = vmatpush.msra.mxu1 %v375_v19  ;;  %v358_v34 = vld [vmem:[#allocation7 + $0x40] sm:$0xff]  ;;  %v359_v35 = vld [vmem:[#allocation7 + $0x48] sm:$0xff]  ;;  %v356_v36 = vld [vmem:[#allocation7 + $0x30] sm:$0xff]  ;;  %p803_p2 = por %p802_p10, %p801_p9 }
  0x42   : > { %v357_v37 = vld [vmem:[#allocation7 + $0x38] sm:$0xff]  ;;  %v354_v38 = vld [vmem:[#allocation7 + $0x20] sm:$0xff]  ;;  %v355_v39 = vld [vmem:[#allocation7 + $0x28] sm:$0xff]  ;;  %p799_p8 = pneg %p798_p4 }
  0x43   : > { %v316_v8 = vsub.f32 1.0, %v315_v7  ;;  %392 = vmatpush.msra.mxu0 %v372_v20  ;;  %412 = vmatpush.msra.mxu1 %v373_v21  ;;  %v352_v40 = vld [vmem:[#allocation7 + $0x10] sm:$0xff]  ;;  %v353_v41 = vld [vmem:[#allocation7 + $0x18] sm:$0xff]  ;;  %v350_v42 = vld [vmem:[#allocation7] sm:$0xff] }
  0x44   : > { %v351_v43 = vld [vmem:[#allocation7 + $0x8] sm:$0xff]  ;;  %v684_v53 = vld [vmem:[#allocation5] ss:$0 sm:$0xff]  ;;  %p804_p11 = pnand %p803_p2, %p799_p8 }
  0x45   : > { %v317_v9 = vmul.f32 %v687_v6, %v316_v8  ;;  %393 = vmatpush.msra.mxu0 %v370_v22  ;;  %413 = vmatpush.msra.mxu1 %v371_v23  ;;  %v685_v56 = vld [vmem:[%s1102_s2] ss:$0 sm:$0xff] }
  0x47   : > { %v318_v10 = vadd.f32 %v687_v6, %v317_v9  ;;  %394 = vmatpush.msra.mxu0 %v368_v24  ;;  %414 = vmatpush.msra.mxu1 %v369_v25 }
  0x49   : > { %v1034_v11 = vsel %vm319_vm0, %v687_v6, %v318_v10  ;;  %395 = vmatpush.msra.mxu0 %v366_v26  ;;  %415 = vmatpush.msra.mxu1 %v367_v27 }
  0x4b   : > { %396 = vmatpush.msra.mxu0 %v364_v28  ;;  %416 = vmatpush.msra.mxu1 %v365_v29 }
  0x4d   : > { %397 = vmatpush.msra.mxu0 %v362_v30  ;;  %417 = vmatpush.msra.mxu1 %v363_v31 }
  0x4f   : > { %398 = vmatpush.msra.mxu0 %v360_v32  ;;  %418 = vmatpush.msra.mxu1 %v361_v33 }
  0x51   : > { %399 = vmatpush.msra.mxu0 %v358_v34  ;;  %419 = vmatpush.msra.mxu1 %v359_v35 }
  0x53   : > { %400 = vmatpush.msra.mxu0 %v356_v36  ;;  %420 = vmatpush.msra.mxu1 %v357_v37 }
  0x55   : > { %401 = vmatpush.msra.mxu0 %v354_v38  ;;  %421 = vmatpush.msra.mxu1 %v355_v39 }
  0x57   : > { %402 = vmatpush.msra.mxu0 %v352_v40  ;;  %422 = vmatpush.msra.mxu1 %v353_v41 }
  0x59   : > { %403 = vmatpush.msra.mxu0 %v350_v42  ;;  %423 = vmatpush.msra.mxu1 %v351_v43 }
  0xad   : > { %v313_v12 = vpop.xlane.xlu0 %312 }
  0xae   : > { %v321_v13 = vmul.f32 %v1034_v11, %v313_v12 }
  0xb0   : > { %v1037_v14 = vsub.f32 %v311_v0, %v321_v13 }
  0xb2   : > { %v323_v15 = vmul.f32 %v1037_v14, %v1037_v14 }
  0xb4   : > { %324 = vadd.xlane.f32.xlu0 %v323_v15 }
 0x127   : > { %v325_v44 = vpop.xlane.xlu0 %324 }
 0x128   : > { %v326_v45 = vmul.f32 %v325_v44, %v1034_v11 }
 0x12a   : > { %v327_v46 = vadd.f32 1e-05, %v326_v45 }
 0x12c   : > { %688 = vrsqrt.f32 %v327_v46  ;;  %vm334_vm2 = vweird.f32 %v327_v46 }
 0x132   : > { %v689_v47 = vpop.eup %688 }
 0x133   : > { %v329_v48 = vmul.f32 %v689_v47, %v327_v46  ;;  %vm335_vm1 = vweird.f32 %v689_v47 }
 0x134   : > { %vm336_vm3 = vmor %vm334_vm2, %vm335_vm1 }
 0x135   : > { %v330_v49 = vmul.f32 %v689_v47, %v329_v48 }
 0x137   : > { %v331_v50 = vmul.f32 0.5, %v330_v49 }
 0x139   : > { %v332_v51 = vsub.f32 1.5, %v331_v50 }
 0x13b   : > { %v333_v52 = vmul.f32 %v689_v47, %v332_v51 }
 0x13d   : > { %v337_v54 = vsel %vm336_vm3, %v689_v47, %v333_v52 }
 0x13e   : > { %v338_v55 = vmul.f32 %v337_v54, %v1037_v14 }
 0x140   : > { %v343_v57 = vmul.f32 %v684_v53, %v338_v55 }
 0x142   : > { %v348_v58 = vadd.f32 %v685_v56, %v343_v57 }
 0x144   : > { %404 = vmatmul.f32.vlgmr.msra.gmra.mxu0 %v348_v58  ;;  %424 = vmatmul.f32.vlgmr.msra.gmra.mxu1 %v348_v58  ;;  %349 = vst [vmem:[%s310_s15] sm:$0xff] %v348_v58 }
 0x145   : > { %807 = shalt.err (!%p804_p11)
}
 0x146   : > { %620 = dma.vmem_to_hbm [thread:$0]  (%p993_p5), %s464_s7, 128, %s466_s10, %s436_s11   ;;  %v382_v59 = vld [vmem:[%s1104_s4] sm:$0x3] }
 0x147   : > { %s599_s14 = sshll.u32 %s1020_s30, 4  ;;  %s608_s15 = sshll.u32 %s945_s25, 4  ;;  %v384_v60 = vperm.slane %v382_v59, 0  ;;  %v385_v61 = vperm.slane %v382_v59, 1 }
 0x148   : > { %s447_s0 = scalar_lea.hbm %s1105_s5, %s608_s15  ;;  %s303_s12 = scalar_lea.vmem [#allocation8], %s599_s14 }
 0x149   : > { %s449_s9 = sshll.u32 %s303_s12, 4  ;;  %s451_s27 = sshll.u32 %s447_s0, 4  ;;  %s450_s9 = int_to_ptr.vmem [resolvable:$true] %s449_s9  ;;  %s452_s27 = int_to_ptr.hbm [resolvable:$true] %s451_s27 }
 0x14a   : > { %s431_s25 = scalar_lea.sflag [#allocation4], %s1020_s30  ;;  %s822_s7 = sshra.s32 %s452_s27, 4  ;;  %s823_s7 = int_to_ptr.hbm [resolvable:$true] %s822_s7 }
 0x14b   : > { %s824_s10 = scalar_lea.hbm %s823_s7, 16  ;;  %s828_s8 = scalar_lea.hbm %s1105_s5, 32 }
 0x14c   : > { %p825_p12 = scmp.ne.s32.totalorder %s823_s7, %s824_s10  ;;  %p829_p3 = scmp.lt.s32.totalorder %s823_s7, %s1105_s5 }
 0x14d   : > { %p830_p7 = scmp.lt.s32.totalorder %s828_s8, %s824_s10 }
 0x14e   : > { %p826_p13 = pnand %p825_p12, %p993_p5 }
 0x14f   : > { %p831_p1 = por %p830_p7, %p829_p3 }
 0x150   : > { %p827_p0 = pneg %p826_p13 }
 0x152   : > { %p832_p4 = pnand %p831_p1, %p827_p0 }
 0x1c1   : > { %v405_v62 = vpop.f32.mrf.mxu0  ;;  %v425_v63 = vpop.f32.mrf.mxu1 }
 0x1c2   : > { %v406_v0 = vadd.f32 %v405_v62, %v384_v60  ;;  %v426_v1 = vadd.f32 %v425_v63, %v385_v61 }
 0x1c4   : > { %428 = vst [vmem:[%s303_s12] sm:$0xff] %v406_v0 }
 0x1c5   : > { %429 = vst [vmem:[%s303_s12 + $0x8] sm:$0xff] %v426_v1 }
 0x1c6   : > { %835 = shalt.err (!%p832_p4)
}
 0x1c7   : > { %619 = dma.vmem_to_hbm [thread:$0]  (%p993_p5), %s450_s9, 256, %s452_s27, %s431_s25  }
 0x1c8 PF: > { %s477_s30 = sand.u32 1, %s870_s21   ;;  %p1114_p8 = scmp.ge.s32.totalorder %s882_s24, 2 }
 0x1c9   : > { %s478_s16 = scalar_lea.sflag [#allocation4], %s477_s30 }
 0x1ca   : > { %p635_p9 = pnand %p1114_p8, %p959_p6 }
 0x1cc   : > { %p636_p10 = pneg %p635_p9 }
 0x1ce   : > { %861 = dma.done.wait (%p636_p10), %s478_s16, 256  }
 0x1cf   : > { %863 = vsyncadd (%p636_p10), %s478_s16, 4294967040  ;;  %s488_s17 = scalar_lea.sflag [#allocation10], %s477_s30 }
 0x1d0   : > { %865 = dma.done.wait (%p636_p10), %s488_s17, 128  }
 0x1d1   : > { %867 = vsyncadd (%p636_p10), %s488_s17, 4294967168  ;;  %p24_p5 = scmp.ge.s32.totalorder %s980_s18, 4   ;;  %s1115_s21 = smov %s874_s22 }
 0x1d2   : > { %s1116_s22 = smov %s878_s23  ;;  %s1117_s23 = smov %s989_s26 }
 0x1d3   : > { %s1118_s24 = smov %s980_s18  ;;  %26 = sbr.rel (!%p24_p5) target bundleno = 10 (0xa), region = 110 }
 0x1d8   :  { %494 = vsyncpa [#allocation3], 1 }
 0x1d9   :  { %496 = vsyncpa [#allocation3 + $0x1], 1 }
 0x1da   :  { %497 = vsyncpa [#allocation6], 1 }
 0x1db   :  { %498 = vsyncpa [#allocation4], 1 }
 0x1dc   :  { %500 = vsyncpa [#allocation4 + $0x1], 1 }
 0x1dd   :  { %501 = vsyncpa [#allocation10], 1 }
 0x1de   :  { %503 = vsyncpa [#allocation10 + $0x1], 1 }

</bundles_post_ra>
